<compile_context>
chip_gen: v5e
topology: v5e:2x2
jax: 0.10.0
libtpu: 0.0.40
codegen_flags: <defaults>
</compile_context>

<pallas_src>
import functools

import jax
import jax.numpy as jnp
from jax.experimental import pallas as pl
from jax.experimental.pallas import tpu as pltpu

_LANE = 128
_SUBLANE = 8
_NEG_BIG = -1e30  # stands in for -inf; exp() of (−1e30 − m) underflows to 0


def _round_up(x: int, m: int) -> int:
    return ((x + m - 1) // m) * m


def _choose_tile_lc(Lc: int, Lq_p: int, D_p: int, itemsize: int,
                    budget_bytes: int = 24 * 1024 * 1024,
                    max_tile: int = 512) -> int:
    """Largest Lc tile (multiple of 8, <= max_tile) whose working set fits the budget."""
    # query block: double-buffered, resident across the inner (Lc-tile) axis
    fixed = 2 * Lq_p * D_p * itemsize
    # per context row: 2x context tile + 2x output tile (double-buffered) plus
    # ~3 fp32 (tile, Lq) intermediates (att/e/p) and one fp32 (tile, D) result.
    per_row = 4 * D_p * itemsize + 3 * Lq_p * 4 + D_p * 4
    avail = max(budget_bytes - fixed, _SUBLANE * per_row)
    tile = max(_SUBLANE, min(max_tile, avail // per_row))
    tile = (tile // _SUBLANE) * _SUBLANE
    return int(min(tile, _round_up(Lc, _SUBLANE)))


def _mask_attention_kernel(q_ref, c_ref, o_ref):
    # q_ref: (Lq_p, D_p)   c_ref: (TILE_LC, D_p)   o_ref: (TILE_LC, D_p)
    q = q_ref[...]
    c = c_ref[...]

    # attention = context @ query^T, contracting over D directly (no explicit
    # transpose of q); accumulate in fp32 on the MXU.
    att = jax.lax.dot_general(
        c, q,
        dimension_numbers=(((1,), (1,)), ((), ())),
        preferred_element_type=jnp.float32)                   # (TILE_LC, Lq_p)

    # Fused masked softmax:
    #   exact zeros -> -1e30 (plays the role of -inf; exp underflows to 0),
    #   rows where *everything* was masked (row max == -1e30) -> output 0,
    #   which reproduces torch's NaN -> 0 cleanup without NaN arithmetic.
    att_m = jnp.where(att == 0.0, jnp.float32(_NEG_BIG), att)
    m = jnp.max(att_m, axis=-1, keepdims=True)
    row_all_masked = m <= jnp.float32(_NEG_BIG)
    e = jnp.exp(att_m - m)
    s = jnp.sum(e, axis=-1, keepdims=True)
    p = e * pl.reciprocal(s, approx=True)                     # EUP, not VPU divide
    p = jnp.where(row_all_masked, jnp.float32(0.0), p)

    # context_vec = final_attention @ query
    out = jnp.dot(p.astype(q.dtype), q, preferred_element_type=jnp.float32)
    o_ref[...] = out.astype(o_ref.dtype)


@functools.partial(jax.jit, static_argnames=("max_tile_lc",))
def mask_attention(query: jax.Array, context: jax.Array, *,
                   max_tile_lc: int = 512) -> jax.Array:
    """query: (B, Lq, D), context: (B, Lc, D) -> (B, Lc, D)"""
    B, Lq, D = query.shape
    Bc, Lc, Dc = context.shape
    assert B == Bc and D == Dc

    # Lane-friendly padding: Lq is the lane dim of the attention slab, D is the
    # lane dim of the q/c/output blocks.  Zero padding is semantics-neutral
    # (padded logits are exactly 0 and hence masked; padded rows are sliced off).
    Lq_p = _round_up(Lq, _LANE)
    D_p = _round_up(D, _LANE)
    itemsize = jnp.dtype(query.dtype).itemsize
    tile_lc = _choose_tile_lc(Lc, Lq_p, D_p, itemsize, max_tile=max_tile_lc)
    Lc_p = _round_up(Lc, tile_lc)

    q_p = jnp.pad(query, ((0, 0), (0, Lq_p - Lq), (0, D_p - D)))
    c_p = jnp.pad(context, ((0, 0), (0, Lc_p - Lc), (0, D_p - D)))

    grid = (B, Lc_p // tile_lc)

    out_p = pl.pallas_call(
        _mask_attention_kernel,
        out_shape=jax.ShapeDtypeStruct((B, Lc_p, D_p), query.dtype),
        grid_spec=pltpu.PrefetchScalarGridSpec(
            num_scalar_prefetch=0,
            grid=grid,
            in_specs=[
                # query: resident across the Lc-tile axis (index_map ignores j)
                pl.BlockSpec((None, Lq_p, D_p), lambda b, j: (b, 0, 0)),
                # context: streamed tile-by-tile over Lc
                pl.BlockSpec((None, tile_lc, D_p), lambda b, j: (b, j, 0)),
            ],
            out_specs=pl.BlockSpec((None, tile_lc, D_p), lambda b, j: (b, j, 0)),
        ),
        compiler_params=pltpu.CompilerParams(
            # Both axes are independent -> shard across v7x's two TensorCores.
            dimension_semantics=("parallel", "parallel"),
            # Explicit scoped-VMEM cap with headroom below v7x's 64 MiB physical.
            vmem_limit_bytes=48 * 1024 * 1024,
        ),
    )(q_p, c_p)

    return out_p[:, :Lc, :D]


def _reference(query, context):
    # Pure-JAX reference mirroring the PyTorch forward.
    att = jnp.einsum("bcd,bqd->bcq", context, query)
    att_m = jnp.where(att == 0.0, -jnp.inf, att)
    att_m = jax.nn.softmax(att_m, axis=-1)
    att_m = jnp.where(jnp.isnan(att_m), 0.0, att_m)
    return jnp.einsum("bcq,bqd->bcd", att_m, query)


if __name__ == "__main__":
    key = jax.random.PRNGKey(0)
    kq, kc = jax.random.split(key)

    B, Lq, Lc, D = 2, 8, 16, 32
    query = jax.random.normal(kq, (B, Lq, D), dtype=jnp.float32)
    context = jax.random.normal(kc, (B, Lc, D), dtype=jnp.float32)

    out = mask_attention(query, context)
    out = jax.block_until_ready(out)

    ref = _reference(query, context)
    assert out.shape == (B, Lc, D)
    # Tolerance accounts for the EUP approximate reciprocal in the softmax
    # normalization (semantic errors would be O(1), far above this).
    assert jnp.allclose(out, ref, atol=1e-2, rtol=1e-2), float(
        jnp.max(jnp.abs(out - ref)))

    print("KERNEL_OK")
</pallas_src>

<mosaic_0001>
module attributes {stable_mosaic.version = 11 : i64} {
  func.func @_mask_attention_kernel(%arg0: i32, %arg1: i32, %arg2: memref<1x128x128xf32, #tpu.memory_space<vmem>>, %arg3: memref<1x16x128xf32, #tpu.memory_space<vmem>>, %arg4: memref<1x16x128xf32, #tpu.memory_space<vmem>>) attributes {dimension_semantics = [#tpu.dimension_semantics<parallel>, #tpu.dimension_semantics<parallel>], iteration_bounds = array<i64: 2, 1>, scalar_prefetch = 0 : i64, scratch_operands = 0 : i64, tpu.core_type = #tpu.core_type<tc>, window_params = [{transform_indices = @transform_0, window_bounds = array<i64: 1, 128, 128>}, {transform_indices = @transform_1, window_bounds = array<i64: 1, 16, 128>}, {transform_indices = @transform_2, window_bounds = array<i64: 1, 16, 128>}]} {
    %c0 = arith.constant 0 : index
    %c0_0 = arith.constant 0 : index
    %c0_1 = arith.constant 0 : index
    %0 = vector.load %arg2[%c0, %c0_0, %c0_1] : memref<1x128x128xf32, #tpu.memory_space<vmem>>, vector<1x128x128xf32>
    %1 = vector.shape_cast %0 : vector<1x128x128xf32> to vector<128x128xf32>
    %c0_2 = arith.constant 0 : index
    %c0_3 = arith.constant 0 : index
    %c0_4 = arith.constant 0 : index
    %2 = vector.load %arg3[%c0_2, %c0_3, %c0_4] : memref<1x16x128xf32, #tpu.memory_space<vmem>>, vector<1x16x128xf32>
    %3 = vector.shape_cast %2 : vector<1x16x128xf32> to vector<16x128xf32>
    %cst = arith.constant dense<0.000000e+00> : vector<16x128xf32>
    %4 = tpu.matmul %3, %1, %cst {dimension_numbers = #tpu.dot_dimension_numbers<[1], [1], [0], [0], [0, 0, 1, 0], [], []>} : vector<16x128xf32>, vector<128x128xf32>, vector<16x128xf32> -> vector<16x128xf32>
    %cst_5 = arith.constant 0.000000e+00 : f32
    %5 = vector.broadcast %cst_5 : f32 to vector<16x128xf32>
    %6 = arith.cmpf oeq, %4, %5 : vector<16x128xf32>
    %cst_6 = arith.constant -1.000000e+30 : f32
    %7 = vector.broadcast %cst_6 : f32 to vector<16x128xf32>
    %8 = arith.select %6, %7, %4 : vector<16x128xi1>, vector<16x128xf32>
    %cst_7 = arith.constant dense<0xFF800000> : vector<16xf32>
    %9 = vector.multi_reduction <maximumf>, %8, %cst_7 [1] : vector<16x128xf32> to vector<16xf32>
    %10 = vector.shape_cast %9 : vector<16xf32> to vector<16x1xf32>
    %cst_8 = arith.constant -1.000000e+30 : f32
    %11 = vector.broadcast %cst_8 : f32 to vector<16x1xf32>
    %12 = arith.cmpf ole, %10, %11 : vector<16x1xf32>
    %13 = vector.broadcast %10 : vector<16x1xf32> to vector<16x128xf32>
    %14 = arith.subf %8, %13 : vector<16x128xf32>
    %15 = math.exp %14 : vector<16x128xf32>
    %cst_9 = arith.constant dense<0.000000e+00> : vector<16xf32>
    %16 = vector.multi_reduction <add>, %15, %cst_9 [1] : vector<16x128xf32> to vector<16xf32>
    %17 = vector.shape_cast %16 : vector<16xf32> to vector<16x1xf32>
    %18 = tpu.reciprocal %17 {approx = true} : vector<16x1xf32> -> vector<16x1xf32>
    %19 = vector.broadcast %18 : vector<16x1xf32> to vector<16x128xf32>
    %20 = arith.mulf %15, %19 : vector<16x128xf32>
    %cst_10 = arith.constant 0.000000e+00 : f32
    %21 = vector.shape_cast %12 : vector<16x1xi1> to vector<16x1xi1>
    %22 = vector.broadcast %21 : vector<16x1xi1> to vector<16x128xi1>
    %23 = vector.broadcast %cst_10 : f32 to vector<16x128xf32>
    %24 = arith.select %22, %23, %20 : vector<16x128xi1>, vector<16x128xf32>
    %cst_11 = arith.constant dense<0.000000e+00> : vector<16x128xf32>
    %25 = tpu.matmul %24, %1, %cst_11 {dimension_numbers = #tpu.dot_dimension_numbers<[1], [0], [0], [1], [0, 0, 1, 1], [], []>} : vector<16x128xf32>, vector<128x128xf32>, vector<16x128xf32> -> vector<16x128xf32>
    %c0_12 = arith.constant 0 : index
    %c0_13 = arith.constant 0 : index
    %c0_14 = arith.constant 0 : index
    %26 = vector.load %arg4[%c0_12, %c0_13, %c0_14] : memref<1x16x128xf32, #tpu.memory_space<vmem>>, vector<1x16x128xf32>
    %27 = vector.shape_cast %26 : vector<1x16x128xf32> to vector<16x128xf32>
    %28 = vector.shape_cast %25 : vector<16x128xf32> to vector<1x16x128xf32>
    tpu.vector_store %arg4[%c0_12, %c0_13, %c0_14], %28 {strides = array<i32>} : memref<1x16x128xf32, #tpu.memory_space<vmem>>, vector<1x16x128xf32>,
    return
  }
  func.func @transform_0(%arg0: i32, %arg1: i32) -> (i32, i32, i32) {
    %c0_i32 = arith.constant 0 : i32
    %c0_i32_0 = arith.constant 0 : i32
    %c0_i32_1 = arith.constant 0 : i32
    return %arg0, %c0_i32, %c0_i32_0 : i32, i32, i32
  }
  func.func @transform_1(%arg0: i32, %arg1: i32) -> (i32, i32, i32) {
    %c0_i32 = arith.constant 0 : i32
    %c0_i32_0 = arith.constant 0 : i32
    return %arg0, %arg1, %c0_i32 : i32, i32, i32
  }
  func.func @transform_2(%arg0: i32, %arg1: i32) -> (i32, i32, i32) {
    %c0_i32 = arith.constant 0 : i32
    %c0_i32_0 = arith.constant 0 : i32
    return %arg0, %arg1, %c0_i32 : i32, i32, i32
  }
}

</mosaic_0001>

<bundles_post_ra>
// kernel: mask_attention.1
= control target key start
LH: loop header
LB: loop body
LE: loop exit
PB: predicated region body
PF: predicated region fallthrough
CT: control target
= control target key end

     0   :  { %7 = vsyncpa [#allocation3], 0  ;;  %s720_s0 = inlined_call_operand.vmem [shape: f32[2,128,128], index: 0, kind: input, shape index: {}]   ;;  %s721_s1 = inlined_call_operand.vmem [shape: f32[2,16,128], index: 1, kind: input, shape index: {}]   ;;  %s722_s2 = inlined_call_operand.hbm [shape: f32[2,16,128], index: 2, kind: output, shape index: {}]  }
   0x1   :  { %9 = vsyncpa [#allocation3 + $0x1], 0  ;;  %s598_s9 = smov 0   ;;  %s600_s10 = smov 0  }
   0x2   :  { %s602_s11 = smov 0   ;;  %s604_s12 = smov 0  }
   0x3   :  { %s606_s13 = smov 0   ;;  %s608_s14 = smov 0  }
   0x4 LB: > { %s398_s15 = sadd.s32 4294967295, %s579_s14   ;;  %s399_s16 = sadd.s32 4294967294, %s579_s14   ;;  %s579_s14 = sphi %s608_s14, %s15_s14   ;;  %s575_s13 = sphi %s606_s13, %s729_s13   ;;  %s571_s12 = sphi %s604_s12, %s728_s12   ;;  %s567_s11 = sphi %s602_s11, %s727_s11   ;;  %s563_s10 = sphi %s600_s10, %s726_s10   ;;  %s559_s9 = sphi %s598_s9, %s725_s9  }
   0x5   : > { %s27_s17 = sadd.s32 1, %s575_s13  ;;  %s90_s18 = sadd.s32 1, %s567_s11 }
   0x6   : > { %p29_p0 = scmp.ge.s32.totalorder %s27_s17, 2  ;;  %p100_p1 = scmp.ne.s32.totalorder %s567_s11, %s563_s10 }
   0x7   : > { %p101_p2 = scmp.eq.s32.totalorder %s398_s15, 1  ;;  %p106_p3 = scmp.ne.s32.totalorder %s563_s10, %s559_s9 }
   0x8   : > { %s731_s17 = smov (%p29_p0, %s27_s17), 0  ;;  %p107_p5 = scmp.eq.s32.totalorder %s399_s16, 1 }
   0x9   : > { %p638_p4 = por %p101_p2, %p100_p1  ;;  %s85_s20 = ssub.s32 %s575_s13, %s731_s17 }
   0xa   : > { %p402_p6 = scmp.ge.s32.totalorder %s579_s14, 1  ;;  %p88_p7 = scmp.eq.s32.totalorder %s85_s20, 0 }
   0xb   : > { %p645_p8 = por %p107_p5, %p106_p3  ;;  %p146_p9 = scmp.lt.s32.totalorder %s579_s14, 3 }
   0xc   : > { %s651_s22 = scalar_select %p88_p7, %s567_s11, %s90_s18  }
   0xd   : > { %p147_p10 = pnand %p402_p6, %p146_p9 }
   0xe   : > { %p177_p11 = scmp.lt.s32.totalorder (!%p147_p10), %s571_s12, 1  ;;  %s174_s4 = sand.u32 (!%p147_p10), 1, %s563_s10  }
   0xf   : > { %150 = sbr.rel (%p147_p10) target bundleno = 606 (0x25e), region = 28  ;;  %s403_s5 = sshll.u32 (!%p147_p10), %s174_s4, 4 }
  0x10   : > { %s419_s6 = sshll.u32 (!%p147_p10), %s571_s12, 4  ;;  %s176_s16 = scalar_lea.vmem (!%p147_p10), [#allocation2], %s403_s5 }
  0x11   : > { %s303_s15 = scalar_lea.hbm (!%p147_p10), %s722_s2, %s419_s6  ;;  %s304_s18 = sshll.u32 (!%p147_p10), %s176_s16, 4  ;;  %s305_s18 = int_to_ptr.vmem [resolvable:$true] %s304_s18 }
  0x12   : > { %s306_s20 = sshll.u32 (!%p147_p10), %s303_s15, 4  ;;  %s307_s20 = int_to_ptr.hbm [resolvable:$true] %s306_s20 }
  0x14   : > { %s655_s23 = scalar_select %p177_p11, %s571_s12, 1 }
  0x16   : > { %s417_s24 = sshll.u32 %s655_s23, 7  ;;  %s418_s28 = sshll.u32 %s655_s23, 4 }
  0x17   : > { %s661_s27 = scalar_lea.vmem %s720_s0, %s417_s24  ;;  %s190_s3 = scalar_lea.vmem %s721_s1, %s418_s28 }
  0x18   : > { %v208_v0 = vld [vmem:[%s661_s27 + $0x78] sm:$0xff]  ;;  %v207_v1 = vld [vmem:[%s661_s27 + $0x70] sm:$0xff]  ;;  %v206_v2 = vld [vmem:[%s661_s27 + $0x68] sm:$0xff]  ;;  %s290_s23 = scalar_lea.sflag [#allocation3], %s174_s4  ;;  %s515_s24 = sshra.s32 %s307_s20, 4  ;;  %s516_s24 = int_to_ptr.hbm [resolvable:$true] %s515_s24 }
  0x19   : > { %211 = vmatpush.xpose.msra.mxu0 %v208_v0  ;;  %420 = vmatpush.xpose.msra.mxu2 %v208_v0  ;;  %v205_v3 = vld [vmem:[%s661_s27 + $0x60] sm:$0xff]  ;;  %v204_v4 = vld [vmem:[%s661_s27 + $0x58] sm:$0xff]  ;;  %v203_v5 = vld [vmem:[%s661_s27 + $0x50] sm:$0xff]  ;;  %s517_s25 = scalar_lea.hbm %s516_s24, 16  ;;  %p522_p1 = scmp.lt.s32.totalorder %s516_s24, %s722_s2 }
  0x1a   : > { %264 = vmatpush.msra.mxu1 %v208_v0  ;;  %v202_v6 = vld [vmem:[%s661_s27 + $0x48] sm:$0xff]  ;;  %v201_v7 = vld [vmem:[%s661_s27 + $0x40] sm:$0xff]  ;;  %v200_v8 = vld [vmem:[%s661_s27 + $0x38] sm:$0xff]  ;;  %p518_p12 = scmp.ne.s32.totalorder %s516_s24, %s517_s25 }
  0x1b   : > { %v199_v9 = vld [vmem:[%s661_s27 + $0x30] sm:$0xff]  ;;  %v198_v10 = vld [vmem:[%s661_s27 + $0x28] sm:$0xff]  ;;  %v197_v11 = vld [vmem:[%s661_s27 + $0x20] sm:$0xff] }
  0x1c   : > { %265 = vmatpush.msra.mxu1 %v207_v1  ;;  %v196_v12 = vld [vmem:[%s661_s27 + $0x18] sm:$0xff]  ;;  %v195_v13 = vld [vmem:[%s661_s27 + $0x10] sm:$0xff]  ;;  %v194_v14 = vld [vmem:[%s661_s27 + $0x8] sm:$0xff]  ;;  %p519_p13 = pnand %p518_p12, %p638_p4 }
  0x1d   : > { %212 = vmatpush.xpose.msra.mxu0 %v207_v1  ;;  %421 = vmatpush.xpose.msra.mxu2 %v207_v1  ;;  %v193_v15 = vld [vmem:[%s661_s27] sm:$0xff]  ;;  %v210_v17 = vld [vmem:[%s190_s3 + $0x8] sm:$0xff]  ;;  %s521_s27 = scalar_lea.hbm %s722_s2, 32 }
  0x1e   : > { %266 = vmatpush.msra.mxu1 %v206_v2  ;;  %v209_v16 = vld [vmem:[%s190_s3] sm:$0xff]  ;;  %p520_p0 = pneg %p519_p13  ;;  %p523_p2 = scmp.lt.s32.totalorder %s521_s27, %s517_s25 }
  0x20   : > { %267 = vmatpush.msra.mxu1 %v205_v3  ;;  %p524_p3 = por %p523_p2, %p522_p1 }
  0x21   : > { %213 = vmatpush.xpose.msra.mxu0 %v206_v2  ;;  %422 = vmatpush.xpose.msra.mxu2 %v206_v2 }
  0x22   : > { %268 = vmatpush.msra.mxu1 %v204_v4  ;;  %p525_p5 = pnand %p524_p3, %p520_p0 }
  0x24   : > { %269 = vmatpush.msra.mxu1 %v203_v5 }
  0x25   : > { %214 = vmatpush.xpose.msra.mxu0 %v205_v3  ;;  %423 = vmatpush.xpose.msra.mxu2 %v205_v3 }
  0x26   : > { %270 = vmatpush.msra.mxu1 %v202_v6 }
  0x28   : > { %271 = vmatpush.msra.mxu1 %v201_v7 }
  0x29   : > { %215 = vmatpush.xpose.msra.mxu0 %v204_v4  ;;  %424 = vmatpush.xpose.msra.mxu2 %v204_v4 }
  0x2a   : > { %272 = vmatpush.msra.mxu1 %v200_v8 }
  0x2c   : > { %273 = vmatpush.msra.mxu1 %v199_v9 }
  0x2d   : > { %216 = vmatpush.xpose.msra.mxu0 %v203_v5  ;;  %425 = vmatpush.xpose.msra.mxu2 %v203_v5 }
  0x2e   : > { %274 = vmatpush.msra.mxu1 %v198_v10 }
  0x30   : > { %275 = vmatpush.msra.mxu1 %v197_v11 }
  0x31   : > { %217 = vmatpush.xpose.msra.mxu0 %v202_v6  ;;  %426 = vmatpush.xpose.msra.mxu2 %v202_v6 }
  0x32   : > { %276 = vmatpush.msra.mxu1 %v196_v12 }
  0x34   : > { %277 = vmatpush.msra.mxu1 %v195_v13 }
  0x35   : > { %218 = vmatpush.xpose.msra.mxu0 %v201_v7  ;;  %427 = vmatpush.xpose.msra.mxu2 %v201_v7 }
  0x36   : > { %278 = vmatpush.msra.mxu1 %v194_v14 }
  0x38   : > { %279 = vmatpush.msra.mxu1 %v193_v15 }
  0x39   : > { %219 = vmatpush.xpose.msra.mxu0 %v200_v8  ;;  %428 = vmatpush.xpose.msra.mxu2 %v200_v8 }
  0x3d   : > { %220 = vmatpush.xpose.msra.mxu0 %v199_v9  ;;  %429 = vmatpush.xpose.msra.mxu2 %v199_v9 }
  0x41   : > { %221 = vmatpush.xpose.msra.mxu0 %v198_v10  ;;  %430 = vmatpush.xpose.msra.mxu2 %v198_v10 }
  0x45   : > { %222 = vmatpush.xpose.msra.mxu0 %v197_v11  ;;  %431 = vmatpush.xpose.msra.mxu2 %v197_v11 }
  0x49   : > { %223 = vmatpush.xpose.msra.mxu0 %v196_v12  ;;  %432 = vmatpush.xpose.msra.mxu2 %v196_v12 }
  0x4d   : > { %224 = vmatpush.xpose.msra.mxu0 %v195_v13  ;;  %433 = vmatpush.xpose.msra.mxu2 %v195_v13 }
  0x51   : > { %225 = vmatpush.xpose.msra.mxu0 %v194_v14  ;;  %434 = vmatpush.xpose.msra.mxu2 %v194_v14 }
  0x55   : > { %226 = vmatpush.xpose.msra.mxu0 %v193_v15  ;;  %435 = vmatpush.xpose.msra.mxu2 %v193_v15 }
  0x58   : > { %227 = vmatmul.f32.vlgmr.msra.gmra.mxu0 %v209_v16  ;;  %230 = vmatmul.f32.vlgmr.msra.gmra.mxu2 %v210_v17 }
  0xd5   : > { %v228_v18 = vpop.f32.mrf.mxu0 }
  0xd6   : > { %vm234_vm0 = vcmp.eq.f32.partialorder %v228_v18, 0.0 }
  0xd7   : > { %v236_v19 = vsel %vm234_vm0, -1e+30, %v228_v18 }
  0xd8   : > { %238 = vmax.xlane.f32.xlu0 %v236_v19 }
  0xdb   : > { %v231_v20 = vpop.f32.mrf.mxu2 }
  0xdc   : > { %vm235_vm1 = vcmp.eq.f32.partialorder %v231_v20, 0.0 }
  0xdd   : > { %v237_v21 = vsel %vm235_vm1, -1e+30, %v231_v20 }
  0xe0   : > { %240 = vmax.xlane.f32.xlu0 %v237_v21 }
 0x14b   : > { %v239_v22 = vpop.xlane.xlu0 %238 }
 0x14c   : > { %v244_v23 = vsub.f32 %v236_v19, %v239_v22  ;;  %vm242_vm2 = vcmp.le.f32.partialorder %v239_v22, -1e+30 }
 0x14d   : > { %vm408_vm3 = vmneg %vm242_vm2 }
 0x14e   : > { %v246_v24 = vmul.f32 1.442695, %v244_v23 }
 0x150   : > { %493 = vpow2.f32 %v246_v24 }
 0x153   : > { %v241_v25 = vpop.xlane.xlu0 %240 }
 0x154   : > { %v245_v26 = vsub.f32 %v237_v21, %v241_v25  ;;  %vm243_vm4 = vcmp.le.f32.partialorder %v241_v25, -1e+30 }
 0x155   : > { %vm410_vm5 = vmneg %vm243_vm4 }
 0x156   : > { %v494_v27 = vpop.eup %493  ;;  %v248_v28 = vmul.f32 1.442695, %v245_v26 }
 0x157   : > { %250 = vadd.xlane.f32.xlu1 %v494_v27 }
 0x158   : > { %495 = vpow2.f32 %v248_v28 }
 0x15e   : > { %v496_v29 = vpop.eup %495 }
 0x15f   : > { %252 = vadd.xlane.f32.xlu1 %v496_v29 }
 0x1ca   : > { %v251_v30 = vpop.xlane.xlu1 %250 }
 0x1cb   : > { %497 = vrcp.f32 %v251_v30 }
 0x1d1   : > { %v498_v31 = vpop.eup %497 }
 0x1d2   : > { %v253_v32 = vpop.xlane.xlu1 %252  ;;  %v256_v33 = vmul.f32 %v498_v31, %v494_v27 }
 0x1d3   : > { %499 = vrcp.f32 %v253_v32 }
 0x1d4   : > { %409 = vmatmul.msk.f32.vlgmr.msra.gmra.mxu1 %vm408_vm3, %v256_v33 }
 0x1d9   : > { %v500_v34 = vpop.eup %499 }
 0x1da   : > { %v257_v35 = vmul.f32 %v500_v34, %v496_v29 }
 0x1dc   : > { %411 = vmatmul.msk.f32.gmra.mxu1 %vm410_vm5, %v257_v35 }
 0x251   : > { %v281_v36 = vpop.f32.mrf.mxu1 }
 0x252   : > { %287 = vst [vmem:[%s176_s16] sm:$0xff] %v281_v36 }
 0x259   : > { %v284_v37 = vpop.f32.mrf.mxu1 }
 0x25a   : > { %288 = vst [vmem:[%s176_s16 + $0x8] sm:$0xff] %v284_v37 }
 0x25b   : > { %528 = shalt.err (!%p525_p5)
}
 0x25c   : > { %s581_s30 = smov 128   ;;  %s582_s3 = smov 8  }
 0x25d   : > { %436 = dma.vmem_to_hbm [thread:$0]  (%p638_p4), %s305_s18, 256, %s307_s20, %s290_s23, %s581_s30, %s581_s30, %s582_s3  }
 0x25e PF: > { %p442_p6 = scmp.ge.s32.totalorder %s579_s14, 2  ;;  %s321_s4 = sand.u32 1, %s559_s9  }
 0x25f   : > { %s322_s5 = scalar_lea.sflag [#allocation3], %s321_s4 }
 0x260   : > { %p439_p7 = pnand %p442_p6, %p645_p8 }
 0x262   : > { %p440_p9 = pneg %p439_p7 }
 0x264   : > { %554 = dma.done.wait (%p440_p9), %s322_s5, 256  }
 0x265   : > { %556 = vsyncadd (%p440_p9), %s322_s5, 4294967040  ;;  %s15_s14 = sadd.s32 1, %s579_s14   ;;  %s725_s9 = smov %s563_s10 }
 0x266   : > { %p12_p10 = scmp.ge.s32.totalorder %s15_s14, 4   ;;  %s726_s10 = smov %s567_s11 }
 0x267   : > { %s727_s11 = smov %s651_s22  ;;  %s728_s12 = smov %s575_s13 }
 0x268   : > { %s729_s13 = smov %s731_s17  ;;  %14 = sbr.rel (!%p12_p10) target bundleno = 4 (0x4), region = 66 }
 0x26d   :  { %328 = vsyncpa [#allocation3], 1 }
 0x26e   :  { %330 = vsyncpa [#allocation3 + $0x1], 1 }

</bundles_post_ra>
